<compile_context>
chip_gen: v5e
topology: v5e:2x2
jax: 0.10.0
libtpu: 0.0.40
codegen_flags: <defaults>
</compile_context>

<pallas_src>
import functools
import math

import jax
import jax.numpy as jnp
from jax.experimental import pallas as pl
from jax.experimental.pallas import tpu as pltpu

LOG_STD_MIN = -7.0
_LANES = 128
_MAX_TILE_ROWS = 4096                 # 4096 * 128 * 4B = 2 MiB per f32 input block
_NUM_PARALLEL = 2                     # shard row-blocks across v7x's 2 TensorCores
_VMEM_LIMIT_BYTES = 48 * 1024 * 1024  # explicit scoped-VMEM budget (all gens)


# ------------------------------- Pallas kernel -------------------------------

def _kl_sums_kernel(mu_q_ref, logs_q_ref, mu_p_ref, logs_p_ref,
                    out_ref, acc_kl_ref, acc_reg_ref,
                    *, total, tile_rows, needs_mask):
    """Fused elementwise KL/reg math + per-parallel-slice sums.

    Inputs are lane-dense (tile_rows, 128) blocks in their native dtype and
    are upcast to f32 in-register.  acc_*_ref are persistent full-tile VMEM
    f32 accumulators (pure VPU adds in the steady state); the single
    cross-lane/sublane collapse happens once at the last step of the
    "arbitrary" axis and is written to the (1, 1, 2) SMEM output block owned
    by this parallel slice.
    """
    p = pl.program_id(0)          # parallel axis (megacore shard)
    s = pl.program_id(1)          # arbitrary axis (sequential row-block loop)
    steps = pl.num_programs(1)

    @pl.when(s == 0)
    def _init():
        acc_kl_ref[...] = jnp.zeros_like(acc_kl_ref)
        acc_reg_ref[...] = jnp.zeros_like(acc_reg_ref)

    mu_q = mu_q_ref[...].astype(jnp.float32)
    mu_p = mu_p_ref[...].astype(jnp.float32)
    logs_q = jnp.maximum(logs_q_ref[...].astype(jnp.float32), LOG_STD_MIN)
    logs_p = jnp.maximum(logs_p_ref[...].astype(jnp.float32), LOG_STD_MIN)

    diff = mu_p - mu_q
    kl = (logs_p - logs_q
          + 0.5 * ((jnp.exp(2.0 * logs_q) + diff * diff)
                   * jnp.exp(-2.0 * logs_p) - 1.0))
    d = logs_q - logs_p
    reg = d * d

    if needs_mask:
        # Element-level validity mask based on the *logical* block id.  This
        # covers (a) the sub-128 padded tail, (b) a partial last block whose
        # out-of-bounds contents are undefined, and (c) phantom blocks when
        # P*steps > num_blocks.  (Assumes total < 2**31 so int32 indexing is
        # sufficient.)
        block_id = p * steps + s
        row = jax.lax.broadcasted_iota(jnp.int32, kl.shape, 0)
        lane = jax.lax.broadcasted_iota(jnp.int32, kl.shape, 1)
        idx = (block_id * tile_rows + row) * _LANES + lane
        mask = idx < total
        kl = jnp.where(mask, kl, 0.0)
        reg = jnp.where(mask, reg, 0.0)

    acc_kl_ref[...] = acc_kl_ref[...] + kl
    acc_reg_ref[...] = acc_reg_ref[...] + reg

    @pl.when(s == steps - 1)
    def _finalize():
        out_ref[0, 0, 0] = jnp.sum(acc_kl_ref[...])
        out_ref[0, 0, 1] = jnp.sum(acc_reg_ref[...])


def _kl_sums(mu_q, logs_q, mu_p, logs_p):
    """Returns (sum(KL_loss), sum(reg_loss)) as two f32 scalars."""
    total = math.prod(mu_q.shape)

    # Lane-dense layout: flatten -> (rows, 128) without copies whenever
    # total is a multiple of 128 (typical activation shapes).  Otherwise pad
    # only the sub-128 remainder (tiny), and mask it out in-kernel anyway.
    padded = -(-total // _LANES) * _LANES
    rows = padded // _LANES

    tile_rows = rows if rows <= _MAX_TILE_ROWS else _MAX_TILE_ROWS
    num_blocks = -(-rows // tile_rows)

    P = _NUM_PARALLEL if num_blocks >= 2 else 1
    steps = -(-num_blocks // P)

    # Mask needed iff the logical (P * steps * tile_rows * 128) coverage
    # exceeds the true element count.
    needs_mask = (P * steps * tile_rows * _LANES) != total

    def prep(a):
        a = a.reshape(-1)                      # native dtype, no upcast copy
        if padded != total:
            a = jnp.pad(a, (0, padded - total))
        return a.reshape(rows, _LANES)

    args = [prep(a) for a in (mu_q, logs_q, mu_p, logs_p)]

    if P * steps == num_blocks:
        in_map = lambda p, s: (p * steps + s, 0)
    else:
        # Phantom trailing blocks re-read the last valid block (their
        # contribution is masked to zero in-kernel).
        in_map = lambda p, s: (jnp.minimum(p * steps + s, num_blocks - 1), 0)

    in_spec = pl.BlockSpec((tile_rows, _LANES), in_map)
    # Per-parallel-slice scalar partials; last two block dims equal the full
    # array dims, leading dim is blocked by the parallel index.
    out_spec = pl.BlockSpec((1, 1, 2), lambda p, s: (p, 0, 0),
                            memory_space=pltpu.MemorySpace.SMEM)

    in_bytes = sum(int(a.size) * a.dtype.itemsize for a in args)
    cost = pl.CostEstimate(flops=16 * total,
                           transcendentals=2 * total,
                           bytes_accessed=in_bytes + P * 2 * 4)

    kernel = functools.partial(_kl_sums_kernel, total=total,
                               tile_rows=tile_rows, needs_mask=needs_mask)

    partials = pl.pallas_call(
        kernel,
        out_shape=jax.ShapeDtypeStruct((P, 1, 2), jnp.float32),
        grid=(P, steps),
        in_specs=[in_spec] * 4,
        out_specs=out_spec,
        scratch_shapes=[pltpu.VMEM((tile_rows, _LANES), jnp.float32),
                        pltpu.VMEM((tile_rows, _LANES), jnp.float32)],
        compiler_params=pltpu.CompilerParams(
            dimension_semantics=("parallel", "arbitrary"),
            vmem_limit_bytes=_VMEM_LIMIT_BYTES),
        cost_estimate=cost,
    )(*args)

    kl_sum = jnp.sum(partials[..., 0])
    reg_sum = jnp.sum(partials[..., 1])
    return kl_sum, reg_sum


# ------------------------------ module forward -------------------------------

def kl_loss_forward(mu_q, logs_q, mu_p, logs_p,
                    regularization=True, size_average=True):
    """Pallas equivalent of KL_Loss.forward -> (loss_tot, KL_loss, reg_loss)."""
    if not regularization:
        # TODO(synk): regularization=False makes the PyTorch forward itself
        # invalid (None * 4.0); only the regularized path is implemented.
        raise NotImplementedError("regularization=False is not supported")

    kl_sum, reg_sum = _kl_sums(mu_q, logs_q, mu_p, logs_p)

    if size_average:
        n = jnp.float32(math.prod(mu_q.shape))
        kl_mean = kl_sum / n
        reg_mean = reg_sum / n
        return kl_mean + 4.0 * reg_mean, kl_mean, reg_mean
    return kl_sum + 4.0 * reg_sum, kl_sum, reg_sum


# ---------------------------- pure-JAX reference -----------------------------

def reference_forward(mu_q, logs_q, mu_p, logs_p):
    mu_q = mu_q.astype(jnp.float32)
    mu_p = mu_p.astype(jnp.float32)
    logs_q = jnp.maximum(logs_q.astype(jnp.float32), LOG_STD_MIN)
    logs_p = jnp.maximum(logs_p.astype(jnp.float32), LOG_STD_MIN)
    kl = (logs_p - logs_q
          + 0.5 * ((jnp.exp(2.0 * logs_q) + (mu_p - mu_q) ** 2)
                   * jnp.exp(-2.0 * logs_p) - 1.0))
    reg = (logs_q - logs_p) ** 2
    tot = kl + 4.0 * reg
    return tot.mean(), kl.mean(), reg.mean()


# ------------------------------------ main ------------------------------------

def _run_case(shape, dtype, atol, rtol):
    key = jax.random.PRNGKey(0)
    k1, k2, k3, k4 = jax.random.split(key, 4)

    mu_q = jax.random.normal(k1, shape, dtype=jnp.float32).astype(dtype)
    logs_q = (0.5 * jax.random.normal(k2, shape, dtype=jnp.float32) - 0.5).astype(dtype)
    mu_p = jax.random.normal(k3, shape, dtype=jnp.float32).astype(dtype)
    logs_p = (0.5 * jax.random.normal(k4, shape, dtype=jnp.float32) - 0.5).astype(dtype)

    tot, kl_m, reg_m = kl_loss_forward(mu_q, logs_q, mu_p, logs_p,
                                       regularization=True, size_average=True)
    tot, kl_m, reg_m = jax.block_until_ready((tot, kl_m, reg_m))

    rtot, rkl, rreg = reference_forward(mu_q, logs_q, mu_p, logs_p)
    rtot, rkl, rreg = jax.block_until_ready((rtot, rkl, rreg))

    assert jnp.allclose(tot, rtot, atol=atol, rtol=rtol), (shape, float(tot), float(rtot))
    assert jnp.allclose(kl_m, rkl, atol=atol, rtol=rtol), (shape, float(kl_m), float(rkl))
    assert jnp.allclose(reg_m, rreg, atol=atol, rtol=rtol), (shape, float(reg_m), float(rreg))


if __name__ == "__main__":
    # Primary spec shape (module test shape), f32, fully regular path.
    _run_case((2, 4, 16, 16), jnp.float32, 1e-5, 1e-5)
    # Native-dtype (bf16) streaming with in-kernel upcast.
    _run_case((2, 4, 16, 16), jnp.bfloat16, 1e-4, 1e-4)
    # Ragged element count (not a multiple of 128): in-kernel mask path.
    _run_case((3, 5, 7), jnp.float32, 1e-5, 1e-5)
    # Multi-block: parallel axis P=2 + partial last block masked in-kernel.
    _run_case((4099, 128), jnp.float32, 1e-5, 1e-4)

    print("KERNEL_OK")
</pallas_src>

<mosaic_0001>
module attributes {stable_mosaic.version = 11 : i64} {
  func.func @_kl_sums_kernel(%arg0: i32, %arg1: i32, %arg2: memref<16x128xf32, #tpu.memory_space<vmem>>, %arg3: memref<16x128xf32, #tpu.memory_space<vmem>>, %arg4: memref<16x128xf32, #tpu.memory_space<vmem>>, %arg5: memref<16x128xf32, #tpu.memory_space<vmem>>, %arg6: memref<1x1x2xf32, #tpu.memory_space<smem>>, %arg7: memref<16x128xf32, #tpu.memory_space<vmem>>, %arg8: memref<16x128xf32, #tpu.memory_space<vmem>>) attributes {dimension_semantics = [#tpu.dimension_semantics<parallel>, #tpu.dimension_semantics<arbitrary>], iteration_bounds = array<i64: 1, 1>, scalar_prefetch = 0 : i64, scratch_operands = 2 : i64, tpu.core_type = #tpu.core_type<tc>, window_params = [{transform_indices = @transform_0, window_bounds = array<i64: 16, 128>}, {transform_indices = @transform_1, window_bounds = array<i64: 16, 128>}, {transform_indices = @transform_2, window_bounds = array<i64: 16, 128>}, {transform_indices = @transform_3, window_bounds = array<i64: 16, 128>}, {transform_indices = @transform_4, window_bounds = array<i64: 1, 1, 2>}]} {
    %c0_i32 = arith.constant 0 : i32
    %0 = arith.cmpi eq, %arg1, %c0_i32 : i32
    %1 = arith.extui %0 : i1 to i32
    %c0_i32_0 = arith.constant 0 : i32
    %2 = arith.cmpi ne, %1, %c0_i32_0 : i32
    scf.if %2 {
      %cst_23 = arith.constant 0.000000e+00 : f32
      %38 = vector.broadcast %cst_23 : f32 to vector<16x128xf32>
      %c0_24 = arith.constant 0 : index
      %c0_25 = arith.constant 0 : index
      %39 = vector.load %arg7[%c0_24, %c0_25] : memref<16x128xf32, #tpu.memory_space<vmem>>, vector<16x128xf32>
      tpu.vector_store %arg7[%c0_24, %c0_25], %38 {strides = array<i32>} : memref<16x128xf32, #tpu.memory_space<vmem>>, vector<16x128xf32>,
      %cst_26 = arith.constant 0.000000e+00 : f32
      %40 = vector.broadcast %cst_26 : f32 to vector<16x128xf32>
      %c0_27 = arith.constant 0 : index
      %c0_28 = arith.constant 0 : index
      %41 = vector.load %arg8[%c0_27, %c0_28] : memref<16x128xf32, #tpu.memory_space<vmem>>, vector<16x128xf32>
      tpu.vector_store %arg8[%c0_27, %c0_28], %40 {strides = array<i32>} : memref<16x128xf32, #tpu.memory_space<vmem>>, vector<16x128xf32>,
    } else {
    }
    %c0 = arith.constant 0 : index
    %c0_1 = arith.constant 0 : index
    %3 = vector.load %arg2[%c0, %c0_1] : memref<16x128xf32, #tpu.memory_space<vmem>>, vector<16x128xf32>
    %c0_2 = arith.constant 0 : index
    %c0_3 = arith.constant 0 : index
    %4 = vector.load %arg4[%c0_2, %c0_3] : memref<16x128xf32, #tpu.memory_space<vmem>>, vector<16x128xf32>
    %c0_4 = arith.constant 0 : index
    %c0_5 = arith.constant 0 : index
    %5 = vector.load %arg3[%c0_4, %c0_5] : memref<16x128xf32, #tpu.memory_space<vmem>>, vector<16x128xf32>
    %cst = arith.constant -7.000000e+00 : f32
    %6 = vector.broadcast %cst : f32 to vector<16x128xf32>
    %7 = arith.maximumf %5, %6 : vector<16x128xf32>
    %c0_6 = arith.constant 0 : index
    %c0_7 = arith.constant 0 : index
    %8 = vector.load %arg5[%c0_6, %c0_7] : memref<16x128xf32, #tpu.memory_space<vmem>>, vector<16x128xf32>
    %cst_8 = arith.constant -7.000000e+00 : f32
    %9 = vector.broadcast %cst_8 : f32 to vector<16x128xf32>
    %10 = arith.maximumf %8, %9 : vector<16x128xf32>
    %11 = arith.subf %4, %3 : vector<16x128xf32>
    %12 = arith.subf %10, %7 : vector<16x128xf32>
    %cst_9 = arith.constant 2.000000e+00 : f32
    %13 = vector.broadcast %cst_9 : f32 to vector<16x128xf32>
    %14 = arith.mulf %13, %7 : vector<16x128xf32>
    %15 = math.exp %14 : vector<16x128xf32>
    %16 = arith.mulf %11, %11 : vector<16x128xf32>
    %17 = arith.addf %15, %16 : vector<16x128xf32>
    %cst_10 = arith.constant -2.000000e+00 : f32
    %18 = vector.broadcast %cst_10 : f32 to vector<16x128xf32>
    %19 = arith.mulf %18, %10 : vector<16x128xf32>
    %20 = math.exp %19 : vector<16x128xf32>
    %21 = arith.mulf %17, %20 : vector<16x128xf32>
    %cst_11 = arith.constant 1.000000e+00 : f32
    %22 = vector.broadcast %cst_11 : f32 to vector<16x128xf32>
    %23 = arith.subf %21, %22 : vector<16x128xf32>
    %cst_12 = arith.constant 5.000000e-01 : f32
    %24 = vector.broadcast %cst_12 : f32 to vector<16x128xf32>
    %25 = arith.mulf %24, %23 : vector<16x128xf32>
    %26 = arith.addf %12, %25 : vector<16x128xf32>
    %27 = arith.subf %7, %10 : vector<16x128xf32>
    %28 = arith.mulf %27, %27 : vector<16x128xf32>
    %c0_13 = arith.constant 0 : index
    %c0_14 = arith.constant 0 : index
    %29 = vector.load %arg7[%c0_13, %c0_14] : memref<16x128xf32, #tpu.memory_space<vmem>>, vector<16x128xf32>
    %30 = arith.addf %29, %26 : vector<16x128xf32>
    %c0_15 = arith.constant 0 : index
    %c0_16 = arith.constant 0 : index
    %31 = vector.load %arg7[%c0_15, %c0_16] : memref<16x128xf32, #tpu.memory_space<vmem>>, vector<16x128xf32>
    tpu.vector_store %arg7[%c0_15, %c0_16], %30 {strides = array<i32>} : memref<16x128xf32, #tpu.memory_space<vmem>>, vector<16x128xf32>,
    %c0_17 = arith.constant 0 : index
    %c0_18 = arith.constant 0 : index
    %32 = vector.load %arg8[%c0_17, %c0_18] : memref<16x128xf32, #tpu.memory_space<vmem>>, vector<16x128xf32>
    %33 = arith.addf %32, %28 : vector<16x128xf32>
    %c0_19 = arith.constant 0 : index
    %c0_20 = arith.constant 0 : index
    %34 = vector.load %arg8[%c0_19, %c0_20] : memref<16x128xf32, #tpu.memory_space<vmem>>, vector<16x128xf32>
    tpu.vector_store %arg8[%c0_19, %c0_20], %33 {strides = array<i32>} : memref<16x128xf32, #tpu.memory_space<vmem>>, vector<16x128xf32>,
    %c0_i32_21 = arith.constant 0 : i32
    %35 = arith.cmpi eq, %arg1, %c0_i32_21 : i32
    %36 = arith.extui %35 : i1 to i32
    %c0_i32_22 = arith.constant 0 : i32
    %37 = arith.cmpi ne, %36, %c0_i32_22 : i32
    scf.if %37 {
      %c0_23 = arith.constant 0 : index
      %c0_24 = arith.constant 0 : index
      %38 = vector.load %arg7[%c0_23, %c0_24] : memref<16x128xf32, #tpu.memory_space<vmem>>, vector<16x128xf32>
      %39 = vector.shape_cast %38 : vector<16x128xf32> to vector<1x16x128xf32>
      %cst_25 = arith.constant dense<0.000000e+00> : vector<1xf32>
      %40 = vector.multi_reduction <add>, %39, %cst_25 [1, 2] : vector<1x16x128xf32> to vector<1xf32>
      %41 = vector.shape_cast %40 : vector<1xf32> to vector<1x1x1xf32>
      %42 = vector.extract %41[0, 0, 0] : f32 from vector<1x1x1xf32>
      %c0_26 = arith.constant 0 : index
      %c0_27 = arith.constant 0 : index
      %c0_28 = arith.constant 0 : index
      %43 = memref.load %arg6[%c0_26, %c0_27, %c0_28] : memref<1x1x2xf32, #tpu.memory_space<smem>>
      memref.store %42, %arg6[%c0_26, %c0_27, %c0_28] : memref<1x1x2xf32, #tpu.memory_space<smem>>
      %c0_29 = arith.constant 0 : index
      %c0_30 = arith.constant 0 : index
      %44 = vector.load %arg8[%c0_29, %c0_30] : memref<16x128xf32, #tpu.memory_space<vmem>>, vector<16x128xf32>
      %45 = vector.shape_cast %44 : vector<16x128xf32> to vector<1x16x128xf32>
      %cst_31 = arith.constant dense<0.000000e+00> : vector<1xf32>
      %46 = vector.multi_reduction <add>, %45, %cst_31 [1, 2] : vector<1x16x128xf32> to vector<1xf32>
      %47 = vector.shape_cast %46 : vector<1xf32> to vector<1x1x1xf32>
      %48 = vector.extract %47[0, 0, 0] : f32 from vector<1x1x1xf32>
      %c0_32 = arith.constant 0 : index
      %c0_33 = arith.constant 0 : index
      %c1 = arith.constant 1 : index
      %49 = memref.load %arg6[%c0_32, %c0_33, %c1] : memref<1x1x2xf32, #tpu.memory_space<smem>>
      memref.store %48, %arg6[%c0_32, %c0_33, %c1] : memref<1x1x2xf32, #tpu.memory_space<smem>>
    } else {
    }
    return
  }
  func.func @transform_0(%arg0: i32, %arg1: i32) -> (i32, i32) {
    %c1_i32 = arith.constant 1 : i32
    %0 = arith.muli %arg0, %c1_i32 : i32
    %1 = arith.addi %0, %arg1 : i32
    %c0_i32 = arith.constant 0 : i32
    %c0_i32_0 = arith.constant 0 : i32
    return %1, %c0_i32 : i32, i32
  }
  func.func @transform_1(%arg0: i32, %arg1: i32) -> (i32, i32) {
    %c1_i32 = arith.constant 1 : i32
    %0 = arith.muli %arg0, %c1_i32 : i32
    %1 = arith.addi %0, %arg1 : i32
    %c0_i32 = arith.constant 0 : i32
    %c0_i32_0 = arith.constant 0 : i32
    return %1, %c0_i32 : i32, i32
  }
  func.func @transform_2(%arg0: i32, %arg1: i32) -> (i32, i32) {
    %c1_i32 = arith.constant 1 : i32
    %0 = arith.muli %arg0, %c1_i32 : i32
    %1 = arith.addi %0, %arg1 : i32
    %c0_i32 = arith.constant 0 : i32
    %c0_i32_0 = arith.constant 0 : i32
    return %1, %c0_i32 : i32, i32
  }
  func.func @transform_3(%arg0: i32, %arg1: i32) -> (i32, i32) {
    %c1_i32 = arith.constant 1 : i32
    %0 = arith.muli %arg0, %c1_i32 : i32
    %1 = arith.addi %0, %arg1 : i32
    %c0_i32 = arith.constant 0 : i32
    %c0_i32_0 = arith.constant 0 : i32
    return %1, %c0_i32 : i32, i32
  }
  func.func @transform_4(%arg0: i32, %arg1: i32) -> (i32, i32, i32) {
    %c0_i32 = arith.constant 0 : i32
    %c0_i32_0 = arith.constant 0 : i32
    %c0_i32_1 = arith.constant 0 : i32
    return %arg0, %c0_i32, %c0_i32_0 : i32, i32, i32
  }
}

</mosaic_0001>

<bundles_post_ra>
// kernel: tpu_custom_call.1
= control target key start
LH: loop header
LB: loop body
LE: loop exit
PB: predicated region body
PF: predicated region fallthrough
CT: control target
= control target key end

     0   :  { %9 = vsyncpa [#allocation5], 0  ;;  %s402_s0 = inlined_call_operand.hbm [shape: f32[16,128], index: 0, kind: input, shape index: {}]   ;;  %s403_s1 = inlined_call_operand.hbm [shape: f32[16,128], index: 1, kind: input, shape index: {}]   ;;  %s404_s2 = inlined_call_operand.hbm [shape: f32[16,128], index: 2, kind: input, shape index: {}]   ;;  %s405_s3 = inlined_call_operand.hbm [shape: f32[16,128], index: 3, kind: input, shape index: {}]   ;;  %s406_s4 = inlined_call_operand.hbm [shape: f32[1,1,2], index: 4, kind: output, shape index: {}]  }
   0x1   :  { %10 = vsyncpa [#allocation8], 0 }
   0x2   :  { %11 = vsyncpa [#allocation11], 0 }
   0x3   :  { %12 = vsyncpa [#allocation6], 0  ;;  %s38_s17 = sshll.u32 %s403_s1, 4  ;;  %s355_s18 = smov [#allocation7]   ;;  %s39_s17 = int_to_ptr.hbm [resolvable:$true] %s38_s17 }
   0x4   :  { %s40_s19 = sshll.u32 %s355_s18, 4  ;;  %s21_s22 = sshll.u32 %s402_s0, 4  ;;  %s41_s19 = int_to_ptr.vmem [resolvable:$true] %s40_s19  ;;  %s22_s22 = int_to_ptr.hbm [resolvable:$true] %s21_s22 }
   0x5   :  { %s356_s23 = smov 128   ;;  %s357_s24 = smov 8  }
   0x6   :  { %46 = dma.hbm_to_vmem [thread:$0]  %s39_s17, 256, %s41_s19, [#allocation8], %s356_s23, %s356_s23, %s357_s24  }
   0x7   :  { %s358_s25 = smov [#allocation4]   ;;  %s55_s29 = sshll.u32 %s404_s2, 4  ;;  %s56_s29 = int_to_ptr.hbm [resolvable:$true] %s55_s29 }
   0x8   :  { %s23_s26 = sshll.u32 %s358_s25, 4  ;;  %s72_s5 = sshll.u32 %s405_s3, 4  ;;  %s24_s26 = int_to_ptr.vmem [resolvable:$true] %s23_s26  ;;  %s73_s5 = int_to_ptr.hbm [resolvable:$true] %s72_s5 }
   0x9   :  { %29 = dma.hbm_to_vmem [thread:$0]  %s22_s22, 256, %s24_s26, [#allocation5], %s356_s23, %s356_s23, %s357_s24  }
   0xa   :  { %s359_s6 = smov [#allocation9]   ;;  %s360_s0 = smov [#allocation10]  }
   0xb   :  { %s57_s7 = sshll.u32 %s359_s6, 4  ;;  %s74_s8 = sshll.u32 %s360_s0, 4  ;;  %s58_s7 = int_to_ptr.vmem [resolvable:$true] %s57_s7  ;;  %s75_s8 = int_to_ptr.vmem [resolvable:$true] %s74_s8 }
   0xc   :  { %63 = dma.hbm_to_vmem [thread:$0]  %s56_s29, 256, %s58_s7, [#allocation8], %s356_s23, %s356_s23, %s357_s24  }
   0xd   :  { %80 = dma.hbm_to_vmem [thread:$0]  %s73_s5, 256, %s75_s8, [#allocation11], %s356_s23, %s356_s23, %s357_s24  }
   0xe   :  { %347 = dma.done.wait [#allocation5], 256  }
   0xf   :  { %348 = vsyncadd [#allocation5], 4294967040 }
  0x10   :  { %349 = dma.done.wait [#allocation8], 512  }
  0x11   :  { %350 = vsyncadd [#allocation8], 4294966784 }
  0x12   :  { %351 = dma.done.wait [#allocation11], 256  }
  0x13   :  { %352 = vsyncadd [#allocation11], 4294967040  ;;  %v117_v0 = vld [vmem:[#allocation7] sm:$0xff]  ;;  %v118_v1 = vld [vmem:[#allocation7 + $0x8] sm:$0xff]  ;;  %s205_s10 = sshll.u32 %s406_s4, 4  ;;  %s361_s12 = smov [#allocation12]   ;;  %s206_s10 = int_to_ptr.hbm [resolvable:$true] %s205_s10 }
  0x14   :  { %v119_v2 = vmax.f32 %v117_v0, -7.0  ;;  %v120_v3 = vmax.f32 %v118_v1, -7.0  ;;  %v121_v4 = vld [vmem:[#allocation10] sm:$0xff]  ;;  %v122_v5 = vld [vmem:[#allocation10 + $0x8] sm:$0xff]  ;;  %v113_v8 = vld [vmem:[#allocation4] sm:$0xff] }
  0x15   :  { %v123_v6 = vmax.f32 %v121_v4, -7.0  ;;  %v124_v7 = vmax.f32 %v122_v5, -7.0  ;;  %v115_v9 = vld [vmem:[#allocation9] sm:$0xff]  ;;  %v114_v12 = vld [vmem:[#allocation4 + $0x8] sm:$0xff] }
  0x16   :  { %v129_v10 = vmul.f32 2.0, %v119_v2  ;;  %v130_v11 = vmul.f32 2.0, %v120_v3  ;;  %v116_v13 = vld [vmem:[#allocation9 + $0x8] sm:$0xff]  ;;  %v125_v18 = vsub.f32 %v115_v9, %v113_v8 }
  0x17   :  { %v139_v14 = vmul.f32 -2.0, %v123_v6  ;;  %v140_v15 = vmul.f32 -2.0, %v124_v7  ;;  %v126_v21 = vsub.f32 %v116_v13, %v114_v12  ;;  %v127_v32 = vsub.f32 %v123_v6, %v119_v2 }
  0x18   :  { %v131_v16 = vmul.f32 1.442695, %v129_v10  ;;  %v133_v17 = vmul.f32 1.442695, %v130_v11  ;;  %v135_v22 = vmul.f32 %v125_v18, %v125_v18  ;;  %v128_v34 = vsub.f32 %v124_v7, %v120_v3 }
  0x19   :  { %v141_v19 = vmul.f32 1.442695, %v139_v14  ;;  %v143_v20 = vmul.f32 1.442695, %v140_v15  ;;  %v136_v23 = vmul.f32 %v126_v21, %v126_v21  ;;  %v153_v40 = vsub.f32 %v119_v2, %v123_v6 }
  0x1a   :  { %231 = vpow2.f32 %v131_v16  ;;  %v154_v41 = vsub.f32 %v120_v3, %v124_v7 }
  0x1b   :  { %233 = vpow2.f32 %v133_v17  ;;  %v155_v43 = vmul.f32 %v153_v40, %v153_v40 }
  0x1c   :  { %235 = vpow2.f32 %v141_v19  ;;  %v156_v44 = vmul.f32 %v154_v41, %v154_v41 }
  0x1d   :  { %237 = vpow2.f32 %v143_v20 }
  0x1e   :  { %v188_v45 = vadd.f32 %v156_v44, %v155_v43 }
  0x20   :  { %v232_v24 = vpop.eup %231 }
  0x21   :  { %v234_v25 = vpop.eup %233  ;;  %v137_v26 = vadd.f32 %v232_v24, %v135_v22 }
  0x22   :  { %v236_v27 = vpop.eup %235  ;;  %v138_v28 = vadd.f32 %v234_v25, %v136_v23 }
  0x23   :  { %v238_v29 = vpop.eup %237  ;;  %v145_v30 = vmul.f32 %v236_v27, %v137_v26 }
  0x24   :  { %v146_v31 = vmul.f32 %v238_v29, %v138_v28 }
  0x25   :  { %v218_v33 = vadd.f32 -1.0, %v145_v30 }
  0x26   :  { %v219_v35 = vadd.f32 -1.0, %v146_v31 }
  0x27   :  { %v149_v36 = vmul.f32 0.5, %v218_v33 }
  0x28   :  { %v150_v37 = vmul.f32 0.5, %v219_v35 }
  0x29   :  { %v151_v38 = vadd.f32 %v149_v36, %v127_v32 }
  0x2a   :  { %v152_v39 = vadd.f32 %v150_v37, %v128_v34 }
  0x2c   :  { %v174_v42 = vadd.f32 %v152_v39, %v151_v38 }
  0x2e   :  { %175 = vadd.xlane.f32.xlu0 %v174_v42 }
  0x36   :  { %189 = vadd.xlane.f32.xlu0 %v188_v45 }
  0xa1   :  { %v176_v46 = vpop.xlane.xlu0 %175 }
  0xa2   :  { %v177_v47 = vrot.slane %v176_v46, 4 }
  0xa4   :  { %v178_v48 = vadd.f32 %v177_v47, %v176_v46 }
  0xa6   :  { %v179_v49 = vrot.slane %v178_v48, 2 }
  0xa8   :  { %v180_v50 = vadd.f32 %v179_v49, %v178_v48 }
  0xa9   :  { %v190_v51 = vpop.xlane.xlu0 %189 }
  0xaa   :  { %v191_v52 = vrot.slane %v190_v51, 4  ;;  %v181_v53 = vrot.slane %v180_v50, 1 }
  0xac   :  { %v192_v54 = vadd.f32 %v191_v52, %v190_v51  ;;  %v182_v55 = vadd.f32 %v181_v53, %v180_v50 }
  0xae   :  { %v193_v56 = vrot.slane %v192_v54, 2  ;;  %220 = vpush %v182_v55 }
  0xb0   :  { %v194_v57 = vadd.f32 %v193_v56, %v192_v54 }
  0xb2   :  { %v195_v58 = vrot.slane %v194_v57, 1 }
  0xb4   :  { %v196_v59 = vadd.f32 %v195_v58, %v194_v57 }
  0xb6   :  { %222 = vpush %v196_v59 }
  0xdf   :  { %s221_s2 = spop %220 }
  0xe0   :  { %185 = sst [smem:[#allocation12]] %s221_s2 }
  0xe7   :  { %s223_s11 = spop %222 }
  0xe8   :  { %199 = sst [smem:[#allocation12 + $0x1]] %s223_s11 }
  0xe9   :  { %208 = dma.smem_to_hbm %s361_s12, 16, %s206_s10, [#allocation6]  }
  0xea   :  { %353 = dma.done.wait [#allocation6], 16  }
  0xeb   :  { %354 = vsyncadd [#allocation6], 4294967280 }
  0xec   :  { %213 = sfence }
  0xed   :  { %214 = vsyncpa [#allocation5], 1 }
  0xee   :  { %215 = vsyncpa [#allocation8], 1 }
  0xef   :  { %216 = vsyncpa [#allocation11], 1 }
  0xf0   :  { %217 = vsyncpa [#allocation6], 1 }

</bundles_post_ra>
